<compile_context>
chip_gen: v7x
topology: tpu7x:2x2x1
jax: 0.10.0
libtpu: 0.0.40
codegen_flags: <defaults>
</compile_context>

<pallas_src>
import functools

import jax
import jax.numpy as jnp
import numpy as np
from jax import lax
from jax.experimental import pallas as pl
from jax.experimental.pallas import tpu as pltpu

EPS = 1e-5


# ------------------------------------------------------------------ kernels
def _bn_relu_conv3x3_kernel(H, W, Cin, Cout,
                            x_ref, s_ref, t_ref, wb_ref, o_ref, pad_ref):
    """out = conv3x3( relu( x*s + t ) ) for one image, lane-dense layout.

    x_ref  : (1, H, W*Cin)       f32  input slab (lane index = w*Cin + ci)
    s_ref  : (1, W*Cin)          f32  folded BN scale (per channel, tiled over w)
    t_ref  : (1, W*Cin)          f32  folded BN shift
    wb_ref : (3, W*Cin, W*Cout)  bf16 banded conv weights (one band per kh tap)
    o_ref  : (1, H, W*Cout)      f32  conv output slab (lane index = w*Cout + co)
    pad_ref: (H+2, W*Cin)        f32  scratch; rows 0 and H+1 are the zero h-halo
    """
    # BN affine + ReLU on the VPU in f32 (broadcasts precomputed in the wrapper).
    a = jnp.maximum(x_ref[0] * s_ref[...] + t_ref[...], 0.0)          # (H, W*Cin)

    # h-direction zero padding: zero only the two halo rows (no full memset);
    # w-direction padding is folded into the banded weights.
    zrow = jnp.zeros((1, W * Cin), jnp.float32)
    pad_ref[0:1, :] = zrow
    pad_ref[H + 1:H + 2, :] = zrow
    pad_ref[1:H + 1, :] = a

    # 3x3 conv = 3 banded matmuls (one per kh row tap): bf16 x bf16 -> f32 on the MXU.
    acc = jnp.zeros((H, W * Cout), jnp.float32)
    for kh in range(3):
        acc = acc + jnp.dot(pad_ref[kh:kh + H, :].astype(jnp.bfloat16),
                            wb_ref[kh],
                            preferred_element_type=jnp.float32)
    o_ref[...] = acc.reshape(1, H, W * Cout)


def _bn_relu_conv3x3_add_shortcut_kernel(H, W, Cin, Cout,
                                         y_ref, x_ref, s_ref, t_ref,
                                         wb_ref, ws_ref, o_ref, pad_ref):
    """out = conv3x3( relu( y*s + t ) ) + conv1x1(x) for one image (lane-dense)."""
    a = jnp.maximum(y_ref[0] * s_ref[...] + t_ref[...], 0.0)          # (H, W*Cout)

    zrow = jnp.zeros((1, W * Cout), jnp.float32)
    pad_ref[0:1, :] = zrow
    pad_ref[H + 1:H + 2, :] = zrow
    pad_ref[1:H + 1, :] = a

    # 1x1 shortcut as one block-diagonal matmul -> already lane-dense (H, W*Cout).
    acc = jnp.dot(x_ref[0].astype(jnp.bfloat16), ws_ref[...],
                  preferred_element_type=jnp.float32)
    for kh in range(3):
        acc = acc + jnp.dot(pad_ref[kh:kh + H, :].astype(jnp.bfloat16),
                            wb_ref[kh],
                            preferred_element_type=jnp.float32)
    o_ref[...] = acc.reshape(1, H, W * Cout)


# --------------------------------------------------- wrapper-side weight plumbing
def _banded_conv3x3_weights(w_hwio, W):
    """(3,3,Cin,Cout) HWIO -> (3, W*Cin, W*Cout) banded weights.

    band[kh, v*Cin+ci, w*Cout+co] = w[kh, v-w+1, ci, co] if v-w+1 in {0,1,2} else 0,
    i.e. the kw taps and the w-direction zero padding are folded into the band.
    """
    Cin, Cout = w_hwio.shape[2], w_hwio.shape[3]
    v = np.arange(W)
    sel = (v[None, :, None] ==
           (np.arange(W)[None, None, :] + np.arange(3)[:, None, None] - 1)
           ).astype(np.float32)                                       # (3, W, W)
    band = jnp.einsum("kvw,hkio->hviwo", jnp.asarray(sel), w_hwio)
    return band.reshape(3, W * Cin, W * Cout)


def _blockdiag_conv1x1_weights(ws, W):
    """(Cin, Cout) -> (W*Cin, W*Cout) block-diagonal weights for a lane-dense 1x1 conv."""
    Cin, Cout = ws.shape
    big = jnp.einsum("vw,io->viwo", jnp.eye(W, dtype=ws.dtype), ws)
    return big.reshape(W * Cin, W * Cout)


@jax.jit
def basic_block_forward(x_nchw, params):
    """x_nchw: (N, Cin, H, W) float32 -> (N, Cout, H, W) float32."""
    x = jnp.transpose(x_nchw, (0, 2, 3, 1)).astype(jnp.float32)        # NCHW -> NHWC
    N, H, W, Cin = x.shape
    Cout = params["w1"].shape[-1]

    def bn_scale_shift(t_nhwc, gamma, beta, C):
        # Training-mode BatchNorm2d statistics (biased variance), hoisted out of the
        # kernels (single fused mean/var sweep) and folded into scale/shift; the
        # per-channel -> lane broadcast is done once here, not inside any loop.
        m = jnp.mean(t_nhwc, axis=(0, 1, 2))
        v = jnp.var(t_nhwc, axis=(0, 1, 2))
        sc = gamma.reshape(-1) * lax.rsqrt(v + EPS)
        sh = beta.reshape(-1) - m * sc
        return (jnp.tile(sc, W).reshape(1, W * C),
                jnp.tile(sh, W).reshape(1, W * C))

    wb1 = _banded_conv3x3_weights(params["w1"], W).astype(jnp.bfloat16)     # (3, W*Cin, W*Cout)
    wb2 = _banded_conv3x3_weights(params["w2"], W).astype(jnp.bfloat16)     # (3, W*Cout, W*Cout)
    wsb = _blockdiag_conv1x1_weights(params["ws"], W).astype(jnp.bfloat16)  # (W*Cin, W*Cout)

    x_slab = x.reshape(N, H, W * Cin)                                  # lane-dense input

    # ---- BN1 + ReLU + conv1, batch-parallel grid ----
    s1, t1 = bn_scale_shift(x, params["g1"], params["b1"], Cin)
    out1 = pl.pallas_call(
        functools.partial(_bn_relu_conv3x3_kernel, H, W, Cin, Cout),
        out_shape=jax.ShapeDtypeStruct((N, H, W * Cout), jnp.float32),
        grid=(N,),
        in_specs=[
            pl.BlockSpec((1, H, W * Cin), lambda n: (n, 0, 0)),         # x slab
            pl.BlockSpec((1, W * Cin), lambda n: (0, 0)),               # scale1
            pl.BlockSpec((1, W * Cin), lambda n: (0, 0)),               # shift1
            pl.BlockSpec((3, W * Cin, W * Cout), lambda n: (0, 0, 0)),  # banded conv1 w
        ],
        out_specs=pl.BlockSpec((1, H, W * Cout), lambda n: (n, 0, 0)),
        scratch_shapes=[pltpu.VMEM((H + 2, W * Cin), jnp.float32)],
        compiler_params=pltpu.CompilerParams(dimension_semantics=("parallel",)),
    )(x_slab, s1, t1, wb1)                                             # (N, H, W*Cout)

    # ---- BN2 + ReLU + conv2 + 1x1 shortcut + residual add ----
    s2, t2 = bn_scale_shift(out1.reshape(N, H, W, Cout),
                            params["g2"], params["b2"], Cout)
    out = pl.pallas_call(
        functools.partial(_bn_relu_conv3x3_add_shortcut_kernel, H, W, Cin, Cout),
        out_shape=jax.ShapeDtypeStruct((N, H, W * Cout), jnp.float32),
        grid=(N,),
        in_specs=[
            pl.BlockSpec((1, H, W * Cout), lambda n: (n, 0, 0)),        # conv1 output
            pl.BlockSpec((1, H, W * Cin), lambda n: (n, 0, 0)),         # x slab (shortcut)
            pl.BlockSpec((1, W * Cout), lambda n: (0, 0)),              # scale2
            pl.BlockSpec((1, W * Cout), lambda n: (0, 0)),              # shift2
            pl.BlockSpec((3, W * Cout, W * Cout), lambda n: (0, 0, 0)),  # banded conv2 w
            pl.BlockSpec((W * Cin, W * Cout), lambda n: (0, 0)),        # block-diag 1x1 w
        ],
        out_specs=pl.BlockSpec((1, H, W * Cout), lambda n: (n, 0, 0)),
        scratch_shapes=[pltpu.VMEM((H + 2, W * Cout), jnp.float32)],
        compiler_params=pltpu.CompilerParams(dimension_semantics=("parallel",)),
    )(out1, x_slab, s2, t2, wb2, wsb)

    return jnp.transpose(out.reshape(N, H, W, Cout), (0, 3, 1, 2))     # NHWC -> NCHW


# ------------------------------------------------------------------ test harness
def init_params(key, in_planes, planes):
    ks = jax.random.split(key, 7)
    return dict(
        w1=0.1 * jax.random.normal(ks[0], (3, 3, in_planes, planes), jnp.float32),
        w2=0.1 * jax.random.normal(ks[1], (3, 3, planes, planes), jnp.float32),
        ws=0.1 * jax.random.normal(ks[2], (in_planes, planes), jnp.float32),
        g1=1.0 + 0.1 * jax.random.normal(ks[3], (1, in_planes), jnp.float32),
        b1=0.1 * jax.random.normal(ks[4], (1, in_planes), jnp.float32),
        g2=1.0 + 0.1 * jax.random.normal(ks[5], (1, planes), jnp.float32),
        b2=0.1 * jax.random.normal(ks[6], (1, planes), jnp.float32),
    )


def reference_forward(x_nchw, params, matmul_dtype=jnp.float32):
    """Pure-JAX reference mirroring the PyTorch forward (training-mode BN).

    matmul_dtype=jnp.bfloat16 reproduces the kernel's MXU precision policy
    (bf16 operands, f32 accumulation) for a tight logic check.
    """
    x = jnp.transpose(x_nchw, (0, 2, 3, 1)).astype(jnp.float32)
    prec = (lax.Precision.HIGHEST if matmul_dtype == jnp.float32
            else lax.Precision.DEFAULT)

    def bn_relu(t, g, b):
        m = jnp.mean(t, axis=(0, 1, 2), keepdims=True)
        v = jnp.var(t, axis=(0, 1, 2), keepdims=True)
        y = (t - m) * lax.rsqrt(v + EPS) * g.reshape(1, 1, 1, -1) + b.reshape(1, 1, 1, -1)
        return jnp.maximum(y, 0.0)

    def conv(t, w):
        return lax.conv_general_dilated(
            t.astype(matmul_dtype), w.astype(matmul_dtype),
            window_strides=(1, 1), padding="SAME",
            dimension_numbers=("NHWC", "HWIO", "NHWC"),
            preferred_element_type=jnp.float32, precision=prec)

    a1 = bn_relu(x, params["g1"], params["b1"])
    o1 = conv(a1, params["w1"])
    a2 = bn_relu(o1, params["g2"], params["b2"])
    o2 = conv(a2, params["w2"])
    sc = jnp.einsum("nhwc,cd->nhwd",
                    x.astype(matmul_dtype), params["ws"].astype(matmul_dtype),
                    preferred_element_type=jnp.float32, precision=prec)
    return jnp.transpose(o2 + sc, (0, 3, 1, 2))


if __name__ == "__main__":
    N, IN_PLANES, PLANES, H, W = 2, 4, 8, 16, 16   # drop_rate = 0.0, stride = 1

    key = jax.random.PRNGKey(0)
    kx, kp = jax.random.split(key)
    x = jax.random.normal(kx, (N, IN_PLANES, H, W), jnp.float32)
    params = init_params(kp, IN_PLANES, PLANES)

    out = jax.block_until_ready(basic_block_forward(x, params))

    # Logic check: reference with the same bf16 matmul operands / f32 accumulation.
    ref_bf16 = jax.block_until_ready(
        reference_forward(x, params, matmul_dtype=jnp.bfloat16))
    np.testing.assert_allclose(np.asarray(out), np.asarray(ref_bf16),
                               rtol=5e-3, atol=5e-3)

    # Numerics check vs. full-f32 reference (bf16 MXU operands => looser tolerance).
    ref_f32 = jax.block_until_ready(
        reference_forward(x, params, matmul_dtype=jnp.float32))
    np.testing.assert_allclose(np.asarray(out), np.asarray(ref_f32),
                               rtol=3e-2, atol=3e-2)

    assert out.shape == (N, PLANES, H, W) and out.dtype == jnp.float32
    print("KERNEL_OK")
</pallas_src>

<mosaic_0001>
module attributes {stable_mosaic.version = 11 : i64} {
  func.func @_bn_relu_conv3x3_kernel(%arg0: i32, %arg1: memref<1x16x64xf32, #tpu.memory_space<vmem>>, %arg2: memref<1x64xf32, #tpu.memory_space<vmem>>, %arg3: memref<1x64xf32, #tpu.memory_space<vmem>>, %arg4: memref<3x64x128xbf16, #tpu.memory_space<vmem>>, %arg5: memref<1x16x128xf32, #tpu.memory_space<vmem>>, %arg6: memref<18x64xf32, #tpu.memory_space<vmem>>) attributes {dimension_semantics = [#tpu.dimension_semantics<parallel>], iteration_bounds = array<i64: 2>, scalar_prefetch = 0 : i64, scratch_operands = 1 : i64, tpu.core_type = #tpu.core_type<tc>, window_params = [{transform_indices = @transform_0, window_bounds = array<i64: 1, 16, 64>}, {pipeline_mode = #tpu.pipeline_mode<synchronous>, transform_indices = @transform_1, window_bounds = array<i64: 1, 64>}, {pipeline_mode = #tpu.pipeline_mode<synchronous>, transform_indices = @transform_2, window_bounds = array<i64: 1, 64>}, {pipeline_mode = #tpu.pipeline_mode<synchronous>, transform_indices = @transform_3, window_bounds = array<i64: 3, 64, 128>}, {transform_indices = @transform_4, window_bounds = array<i64: 1, 16, 128>}]} {
    %c0 = arith.constant 0 : index
    %c0_0 = arith.constant 0 : index
    %c0_1 = arith.constant 0 : index
    %0 = vector.load %arg1[%c0, %c0_0, %c0_1] : memref<1x16x64xf32, #tpu.memory_space<vmem>>, vector<1x16x64xf32>
    %1 = vector.shape_cast %0 : vector<1x16x64xf32> to vector<16x64xf32>
    %c0_2 = arith.constant 0 : index
    %c0_3 = arith.constant 0 : index
    %2 = vector.load %arg2[%c0_2, %c0_3] : memref<1x64xf32, #tpu.memory_space<vmem>>, vector<1x64xf32>
    %3 = vector.broadcast %2 : vector<1x64xf32> to vector<16x64xf32>
    %4 = arith.mulf %1, %3 : vector<16x64xf32>
    %c0_4 = arith.constant 0 : index
    %c0_5 = arith.constant 0 : index
    %5 = vector.load %arg3[%c0_4, %c0_5] : memref<1x64xf32, #tpu.memory_space<vmem>>, vector<1x64xf32>
    %6 = vector.broadcast %5 : vector<1x64xf32> to vector<16x64xf32>
    %7 = arith.addf %4, %6 : vector<16x64xf32>
    %cst = arith.constant 0.000000e+00 : f32
    %8 = vector.broadcast %cst : f32 to vector<16x64xf32>
    %9 = arith.maximumf %7, %8 : vector<16x64xf32>
    %cst_6 = arith.constant 0.000000e+00 : f32
    %10 = vector.broadcast %cst_6 : f32 to vector<1x64xf32>
    %c0_7 = arith.constant 0 : index
    %c0_8 = arith.constant 0 : index
    %11 = vector.load %arg6[%c0_7, %c0_8] : memref<18x64xf32, #tpu.memory_space<vmem>>, vector<1x64xf32>
    tpu.vector_store %arg6[%c0_7, %c0_8], %10 {strides = array<i32>} : memref<18x64xf32, #tpu.memory_space<vmem>>, vector<1x64xf32>,
    %c17 = arith.constant 17 : index
    %c0_9 = arith.constant 0 : index
    %12 = vector.load %arg6[%c17, %c0_9] : memref<18x64xf32, #tpu.memory_space<vmem>>, vector<1x64xf32>
    tpu.vector_store %arg6[%c17, %c0_9], %10 {strides = array<i32>} : memref<18x64xf32, #tpu.memory_space<vmem>>, vector<1x64xf32>,
    %c1 = arith.constant 1 : index
    %c0_10 = arith.constant 0 : index
    %13 = vector.load %arg6[%c1, %c0_10] : memref<18x64xf32, #tpu.memory_space<vmem>>, vector<16x64xf32>
    tpu.vector_store %arg6[%c1, %c0_10], %9 {strides = array<i32>} : memref<18x64xf32, #tpu.memory_space<vmem>>, vector<16x64xf32>,
    %cst_11 = arith.constant 0.000000e+00 : f32
    %14 = vector.broadcast %cst_11 : f32 to vector<16x128xf32>
    %c0_12 = arith.constant 0 : index
    %c0_13 = arith.constant 0 : index
    %15 = vector.load %arg6[%c0_12, %c0_13] : memref<18x64xf32, #tpu.memory_space<vmem>>, vector<16x64xf32>
    %16 = arith.truncf %15 : vector<16x64xf32> to vector<16x64xbf16>
    %c0_14 = arith.constant 0 : index
    %c0_15 = arith.constant 0 : index
    %c0_16 = arith.constant 0 : index
    %17 = vector.load %arg4[%c0_14, %c0_15, %c0_16] : memref<3x64x128xbf16, #tpu.memory_space<vmem>>, vector<1x64x128xbf16>
    %18 = vector.shape_cast %17 : vector<1x64x128xbf16> to vector<64x128xbf16>
    %cst_17 = arith.constant dense<0.000000e+00> : vector<16x128xf32>
    %19 = tpu.matmul %16, %18, %cst_17 {dimension_numbers = #tpu.dot_dimension_numbers<[1], [0], [0], [1], [0, 0, 1, 1], [], []>} : vector<16x64xbf16>, vector<64x128xbf16>, vector<16x128xf32> -> vector<16x128xf32>
    %20 = arith.addf %14, %19 : vector<16x128xf32>
    %c1_18 = arith.constant 1 : index
    %c0_19 = arith.constant 0 : index
    %21 = vector.load %arg6[%c1_18, %c0_19] : memref<18x64xf32, #tpu.memory_space<vmem>>, vector<16x64xf32>
    %22 = arith.truncf %21 : vector<16x64xf32> to vector<16x64xbf16>
    %c1_20 = arith.constant 1 : index
    %c0_21 = arith.constant 0 : index
    %c0_22 = arith.constant 0 : index
    %23 = vector.load %arg4[%c1_20, %c0_21, %c0_22] : memref<3x64x128xbf16, #tpu.memory_space<vmem>>, vector<1x64x128xbf16>
    %24 = vector.shape_cast %23 : vector<1x64x128xbf16> to vector<64x128xbf16>
    %cst_23 = arith.constant dense<0.000000e+00> : vector<16x128xf32>
    %25 = tpu.matmul %22, %24, %cst_23 {dimension_numbers = #tpu.dot_dimension_numbers<[1], [0], [0], [1], [0, 0, 1, 1], [], []>} : vector<16x64xbf16>, vector<64x128xbf16>, vector<16x128xf32> -> vector<16x128xf32>
    %26 = arith.addf %20, %25 : vector<16x128xf32>
    %c2 = arith.constant 2 : index
    %c0_24 = arith.constant 0 : index
    %27 = vector.load %arg6[%c2, %c0_24] : memref<18x64xf32, #tpu.memory_space<vmem>>, vector<16x64xf32>
    %28 = arith.truncf %27 : vector<16x64xf32> to vector<16x64xbf16>
    %c2_25 = arith.constant 2 : index
    %c0_26 = arith.constant 0 : index
    %c0_27 = arith.constant 0 : index
    %29 = vector.load %arg4[%c2_25, %c0_26, %c0_27] : memref<3x64x128xbf16, #tpu.memory_space<vmem>>, vector<1x64x128xbf16>
    %30 = vector.shape_cast %29 : vector<1x64x128xbf16> to vector<64x128xbf16>
    %cst_28 = arith.constant dense<0.000000e+00> : vector<16x128xf32>
    %31 = tpu.matmul %28, %30, %cst_28 {dimension_numbers = #tpu.dot_dimension_numbers<[1], [0], [0], [1], [0, 0, 1, 1], [], []>} : vector<16x64xbf16>, vector<64x128xbf16>, vector<16x128xf32> -> vector<16x128xf32>
    %32 = arith.addf %26, %31 : vector<16x128xf32>
    %33 = vector.shape_cast %32 : vector<16x128xf32> to vector<1x16x128xf32>
    %c0_29 = arith.constant 0 : index
    %c0_30 = arith.constant 0 : index
    %c0_31 = arith.constant 0 : index
    %34 = vector.load %arg5[%c0_29, %c0_30, %c0_31] : memref<1x16x128xf32, #tpu.memory_space<vmem>>, vector<1x16x128xf32>
    tpu.vector_store %arg5[%c0_29, %c0_30, %c0_31], %33 {strides = array<i32>} : memref<1x16x128xf32, #tpu.memory_space<vmem>>, vector<1x16x128xf32>,
    return
  }
  func.func @transform_0(%arg0: i32) -> (i32, i32, i32) {
    %c0_i32 = arith.constant 0 : i32
    %c0_i32_0 = arith.constant 0 : i32
    %c0_i32_1 = arith.constant 0 : i32
    return %arg0, %c0_i32, %c0_i32_0 : i32, i32, i32
  }
  func.func @transform_1(%arg0: i32) -> (i32, i32) {
    %c0_i32 = arith.constant 0 : i32
    %c0_i32_0 = arith.constant 0 : i32
    %c0_i32_1 = arith.constant 0 : i32
    return %c0_i32, %c0_i32_0 : i32, i32
  }
  func.func @transform_2(%arg0: i32) -> (i32, i32) {
    %c0_i32 = arith.constant 0 : i32
    %c0_i32_0 = arith.constant 0 : i32
    %c0_i32_1 = arith.constant 0 : i32
    return %c0_i32, %c0_i32_0 : i32, i32
  }
  func.func @transform_3(%arg0: i32) -> (i32, i32, i32) {
    %c0_i32 = arith.constant 0 : i32
    %c0_i32_0 = arith.constant 0 : i32
    %c0_i32_1 = arith.constant 0 : i32
    %c0_i32_2 = arith.constant 0 : i32
    return %c0_i32, %c0_i32_0, %c0_i32_1 : i32, i32, i32
  }
  func.func @transform_4(%arg0: i32) -> (i32, i32, i32) {
    %c0_i32 = arith.constant 0 : i32
    %c0_i32_0 = arith.constant 0 : i32
    %c0_i32_1 = arith.constant 0 : i32
    return %arg0, %c0_i32, %c0_i32_0 : i32, i32, i32
  }
}

module attributes {stable_mosaic.version = 11 : i64} {
  func.func @_bn_relu_conv3x3_add_shortcut_kernel(%arg0: i32, %arg1: memref<1x16x128xf32, #tpu.memory_space<vmem>>, %arg2: memref<1x16x64xf32, #tpu.memory_space<vmem>>, %arg3: memref<1x128xf32, #tpu.memory_space<vmem>>, %arg4: memref<1x128xf32, #tpu.memory_space<vmem>>, %arg5: memref<3x128x128xbf16, #tpu.memory_space<vmem>>, %arg6: memref<64x128xbf16, #tpu.memory_space<vmem>>, %arg7: memref<1x16x128xf32, #tpu.memory_space<vmem>>, %arg8: memref<18x128xf32, #tpu.memory_space<vmem>>) attributes {dimension_semantics = [#tpu.dimension_semantics<parallel>], iteration_bounds = array<i64: 2>, scalar_prefetch = 0 : i64, scratch_operands = 1 : i64, tpu.core_type = #tpu.core_type<tc>, window_params = [{transform_indices = @transform_0, window_bounds = array<i64: 1, 16, 128>}, {transform_indices = @transform_1, window_bounds = array<i64: 1, 16, 64>}, {pipeline_mode = #tpu.pipeline_mode<synchronous>, transform_indices = @transform_2, window_bounds = array<i64: 1, 128>}, {pipeline_mode = #tpu.pipeline_mode<synchronous>, transform_indices = @transform_3, window_bounds = array<i64: 1, 128>}, {pipeline_mode = #tpu.pipeline_mode<synchronous>, transform_indices = @transform_4, window_bounds = array<i64: 3, 128, 128>}, {pipeline_mode = #tpu.pipeline_mode<synchronous>, transform_indices = @transform_5, window_bounds = array<i64: 64, 128>}, {transform_indices = @transform_6, window_bounds = array<i64: 1, 16, 128>}]} {
    %c0 = arith.constant 0 : index
    %c0_0 = arith.constant 0 : index
    %c0_1 = arith.constant 0 : index
    %0 = vector.load %arg1[%c0, %c0_0, %c0_1] : memref<1x16x128xf32, #tpu.memory_space<vmem>>, vector<1x16x128xf32>
    %1 = vector.shape_cast %0 : vector<1x16x128xf32> to vector<16x128xf32>
    %c0_2 = arith.constant 0 : index
    %c0_3 = arith.constant 0 : index
    %2 = vector.load %arg3[%c0_2, %c0_3] : memref<1x128xf32, #tpu.memory_space<vmem>>, vector<1x128xf32>
    %3 = vector.broadcast %2 : vector<1x128xf32> to vector<16x128xf32>
    %4 = arith.mulf %1, %3 : vector<16x128xf32>
    %c0_4 = arith.constant 0 : index
    %c0_5 = arith.constant 0 : index
    %5 = vector.load %arg4[%c0_4, %c0_5] : memref<1x128xf32, #tpu.memory_space<vmem>>, vector<1x128xf32>
    %6 = vector.broadcast %5 : vector<1x128xf32> to vector<16x128xf32>
    %7 = arith.addf %4, %6 : vector<16x128xf32>
    %cst = arith.constant 0.000000e+00 : f32
    %8 = vector.broadcast %cst : f32 to vector<16x128xf32>
    %9 = arith.maximumf %7, %8 : vector<16x128xf32>
    %cst_6 = arith.constant 0.000000e+00 : f32
    %10 = vector.broadcast %cst_6 : f32 to vector<1x128xf32>
    %c0_7 = arith.constant 0 : index
    %c0_8 = arith.constant 0 : index
    %11 = vector.load %arg8[%c0_7, %c0_8] : memref<18x128xf32, #tpu.memory_space<vmem>>, vector<1x128xf32>
    tpu.vector_store %arg8[%c0_7, %c0_8], %10 {strides = array<i32>} : memref<18x128xf32, #tpu.memory_space<vmem>>, vector<1x128xf32>,
    %c17 = arith.constant 17 : index
    %c0_9 = arith.constant 0 : index
    %12 = vector.load %arg8[%c17, %c0_9] : memref<18x128xf32, #tpu.memory_space<vmem>>, vector<1x128xf32>
    tpu.vector_store %arg8[%c17, %c0_9], %10 {strides = array<i32>} : memref<18x128xf32, #tpu.memory_space<vmem>>, vector<1x128xf32>,
    %c1 = arith.constant 1 : index
    %c0_10 = arith.constant 0 : index
    %13 = vector.load %arg8[%c1, %c0_10] : memref<18x128xf32, #tpu.memory_space<vmem>>, vector<16x128xf32>
    tpu.vector_store %arg8[%c1, %c0_10], %9 {strides = array<i32>} : memref<18x128xf32, #tpu.memory_space<vmem>>, vector<16x128xf32>,
    %c0_11 = arith.constant 0 : index
    %c0_12 = arith.constant 0 : index
    %c0_13 = arith.constant 0 : index
    %14 = vector.load %arg2[%c0_11, %c0_12, %c0_13] : memref<1x16x64xf32, #tpu.memory_space<vmem>>, vector<1x16x64xf32>
    %15 = vector.shape_cast %14 : vector<1x16x64xf32> to vector<16x64xf32>
    %16 = arith.truncf %15 : vector<16x64xf32> to vector<16x64xbf16>
    %c0_14 = arith.constant 0 : index
    %c0_15 = arith.constant 0 : index
    %17 = vector.load %arg6[%c0_14, %c0_15] : memref<64x128xbf16, #tpu.memory_space<vmem>>, vector<64x128xbf16>
    %cst_16 = arith.constant dense<0.000000e+00> : vector<16x128xf32>
    %18 = tpu.matmul %16, %17, %cst_16 {dimension_numbers = #tpu.dot_dimension_numbers<[1], [0], [0], [1], [0, 0, 1, 1], [], []>} : vector<16x64xbf16>, vector<64x128xbf16>, vector<16x128xf32> -> vector<16x128xf32>
    %c0_17 = arith.constant 0 : index
    %c0_18 = arith.constant 0 : index
    %19 = vector.load %arg8[%c0_17, %c0_18] : memref<18x128xf32, #tpu.memory_space<vmem>>, vector<16x128xf32>
    %20 = arith.truncf %19 : vector<16x128xf32> to vector<16x128xbf16>
    %c0_19 = arith.constant 0 : index
    %c0_20 = arith.constant 0 : index
    %c0_21 = arith.constant 0 : index
    %21 = vector.load %arg5[%c0_19, %c0_20, %c0_21] : memref<3x128x128xbf16, #tpu.memory_space<vmem>>, vector<1x128x128xbf16>
    %22 = vector.shape_cast %21 : vector<1x128x128xbf16> to vector<128x128xbf16>
    %cst_22 = arith.constant dense<0.000000e+00> : vector<16x128xf32>
    %23 = tpu.matmul %20, %22, %cst_22 {dimension_numbers = #tpu.dot_dimension_numbers<[1], [0], [0], [1], [0, 0, 1, 1], [], []>} : vector<16x128xbf16>, vector<128x128xbf16>, vector<16x128xf32> -> vector<16x128xf32>
    %24 = arith.addf %18, %23 : vector<16x128xf32>
    %c1_23 = arith.constant 1 : index
    %c0_24 = arith.constant 0 : index
    %25 = vector.load %arg8[%c1_23, %c0_24] : memref<18x128xf32, #tpu.memory_space<vmem>>, vector<16x128xf32>
    %26 = arith.truncf %25 : vector<16x128xf32> to vector<16x128xbf16>
    %c1_25 = arith.constant 1 : index
    %c0_26 = arith.constant 0 : index
    %c0_27 = arith.constant 0 : index
    %27 = vector.load %arg5[%c1_25, %c0_26, %c0_27] : memref<3x128x128xbf16, #tpu.memory_space<vmem>>, vector<1x128x128xbf16>
    %28 = vector.shape_cast %27 : vector<1x128x128xbf16> to vector<128x128xbf16>
    %cst_28 = arith.constant dense<0.000000e+00> : vector<16x128xf32>
    %29 = tpu.matmul %26, %28, %cst_28 {dimension_numbers = #tpu.dot_dimension_numbers<[1], [0], [0], [1], [0, 0, 1, 1], [], []>} : vector<16x128xbf16>, vector<128x128xbf16>, vector<16x128xf32> -> vector<16x128xf32>
    %30 = arith.addf %24, %29 : vector<16x128xf32>
    %c2 = arith.constant 2 : index
    %c0_29 = arith.constant 0 : index
    %31 = vector.load %arg8[%c2, %c0_29] : memref<18x128xf32, #tpu.memory_space<vmem>>, vector<16x128xf32>
    %32 = arith.truncf %31 : vector<16x128xf32> to vector<16x128xbf16>
    %c2_30 = arith.constant 2 : index
    %c0_31 = arith.constant 0 : index
    %c0_32 = arith.constant 0 : index
    %33 = vector.load %arg5[%c2_30, %c0_31, %c0_32] : memref<3x128x128xbf16, #tpu.memory_space<vmem>>, vector<1x128x128xbf16>
    %34 = vector.shape_cast %33 : vector<1x128x128xbf16> to vector<128x128xbf16>
    %cst_33 = arith.constant dense<0.000000e+00> : vector<16x128xf32>
    %35 = tpu.matmul %32, %34, %cst_33 {dimension_numbers = #tpu.dot_dimension_numbers<[1], [0], [0], [1], [0, 0, 1, 1], [], []>} : vector<16x128xbf16>, vector<128x128xbf16>, vector<16x128xf32> -> vector<16x128xf32>
    %36 = arith.addf %30, %35 : vector<16x128xf32>
    %37 = vector.shape_cast %36 : vector<16x128xf32> to vector<1x16x128xf32>
    %c0_34 = arith.constant 0 : index
    %c0_35 = arith.constant 0 : index
    %c0_36 = arith.constant 0 : index
    %38 = vector.load %arg7[%c0_34, %c0_35, %c0_36] : memref<1x16x128xf32, #tpu.memory_space<vmem>>, vector<1x16x128xf32>
    tpu.vector_store %arg7[%c0_34, %c0_35, %c0_36], %37 {strides = array<i32>} : memref<1x16x128xf32, #tpu.memory_space<vmem>>, vector<1x16x128xf32>,
    return
  }
  func.func @transform_0(%arg0: i32) -> (i32, i32, i32) {
    %c0_i32 = arith.constant 0 : i32
    %c0_i32_0 = arith.constant 0 : i32
    %c0_i32_1 = arith.constant 0 : i32
    return %arg0, %c0_i32, %c0_i32_0 : i32, i32, i32
  }
  func.func @transform_1(%arg0: i32) -> (i32, i32, i32) {
    %c0_i32 = arith.constant 0 : i32
    %c0_i32_0 = arith.constant 0 : i32
    %c0_i32_1 = arith.constant 0 : i32
    return %arg0, %c0_i32, %c0_i32_0 : i32, i32, i32
  }
  func.func @transform_2(%arg0: i32) -> (i32, i32) {
    %c0_i32 = arith.constant 0 : i32
    %c0_i32_0 = arith.constant 0 : i32
    %c0_i32_1 = arith.constant 0 : i32
    return %c0_i32, %c0_i32_0 : i32, i32
  }
  func.func @transform_3(%arg0: i32) -> (i32, i32) {
    %c0_i32 = arith.constant 0 : i32
    %c0_i32_0 = arith.constant 0 : i32
    %c0_i32_1 = arith.constant 0 : i32
    return %c0_i32, %c0_i32_0 : i32, i32
  }
  func.func @transform_4(%arg0: i32) -> (i32, i32, i32) {
    %c0_i32 = arith.constant 0 : i32
    %c0_i32_0 = arith.constant 0 : i32
    %c0_i32_1 = arith.constant 0 : i32
    %c0_i32_2 = arith.constant 0 : i32
    return %c0_i32, %c0_i32_0, %c0_i32_1 : i32, i32, i32
  }
  func.func @transform_5(%arg0: i32) -> (i32, i32) {
    %c0_i32 = arith.constant 0 : i32
    %c0_i32_0 = arith.constant 0 : i32
    %c0_i32_1 = arith.constant 0 : i32
    return %c0_i32, %c0_i32_0 : i32, i32
  }
  func.func @transform_6(%arg0: i32) -> (i32, i32, i32) {
    %c0_i32 = arith.constant 0 : i32
    %c0_i32_0 = arith.constant 0 : i32
    %c0_i32_1 = arith.constant 0 : i32
    return %arg0, %c0_i32, %c0_i32_0 : i32, i32, i32
  }
}

</mosaic_0001>

<bundles_post_ra>
// kernel: tile.23
= control target key start
LH: loop header
LB: loop body
LE: loop exit
PB: predicated region body
PF: predicated region fallthrough
CT: control target
= control target key end

     0   :  { %s28_s0 = inlined_call_operand.vmem [shape: f32[4], index: 0, kind: input, shape index: {}]   ;;  %s29_s1 = inlined_call_operand.vmem [shape: f32[16,4], index: 1, kind: output, shape index: {}]  }
   0x1   :  { %v4_v0 = vld [vmem:[%s28_s0] ss:$0 sm:$0xff] }
   0x2   :  { %5 = vst [vmem:[%s29_s1] sm:$0xff] %v4_v0  ;;  %8 = vst [vmem:[%s29_s1 + $0x8] sm:$0xff] %v4_v0 }

// kernel: tile.24
= control target key start
LH: loop header
LB: loop body
LE: loop exit
PB: predicated region body
PF: predicated region fallthrough
CT: control target
= control target key end

     0   :  { %s131_s10 = smov 60   ;;  %s132_s11 = smov 52   ;;  %vm3_vm0 = vcmask 31744   ;;  %vm9_vm1 = vcmask 523744   ;;  %vm15_vm2 = vcmask 490944   ;;  %vm21_vm3 = vcmask 458144   ;;  %s207_s0 = inlined_call_operand.vmem [shape: f32[16,4], index: 0, kind: input, shape index: {}]   ;;  %s208_s1 = inlined_call_operand.vmem [shape: f32[1,64], index: 1, kind: output, shape index: {}]  }
   0x1   :  { %v101_v0 = vld [vmem:[%s207_s0 + $0xf] sm:$0x1]   ;;  %v103_v1 = vld [vmem:[%s207_s0 + $0xd] sm:$0x1]   ;;  %v102_v2 = vld [vmem:[%s207_s0 + $0xe] sm:$0x1]  }
   0x2   :  { %7 = vrot.lane.b32.xlu0 %v101_v0, %s131_s10  ;;  %19 = vrot.lane.b32.xlu1 %v103_v1, %s132_s11  ;;  %v104_v3 = vld [vmem:[%s207_s0 + $0xc] sm:$0x1]   ;;  %s133_s16 = smov 56   ;;  %s134_s17 = smov 48   ;;  %v105_v4 = vld [vmem:[%s207_s0 + $0xb] sm:$0x1]  }
   0x3   :  { %v106_v5 = vld [vmem:[%s207_s0 + $0xa] sm:$0x1]   ;;  %v2_v6 = vld [vmem:[%s207_s0] sm:$0x1]   ;;  %s135_s24 = smov 44   ;;  %s136_s25 = smov 40  }
   0x4   :  { %4 = vst.msk [vmem:[#allocation0] sm:$0x1] %vm3_vm0, %v2_v6   ;;  %v107_v7 = vld [vmem:[%s207_s0 + $0x9] sm:$0x1]   ;;  %v108_v8 = vld [vmem:[%s207_s0 + $0x8] sm:$0x1]  }
   0x5   :  { %s137_s30 = smov 36   ;;  %s138_s2 = smov 32   ;;  %v109_v9 = vld [vmem:[%s207_s0 + $0x7] sm:$0x1]   ;;  %v110_v10 = vld [vmem:[%s207_s0 + $0x6] sm:$0x1]  }
   0x6   :  { %13 = vrot.lane.b32.xlu0 %v102_v2, %s133_s16  ;;  %25 = vrot.lane.b32.xlu1 %v104_v3, %s134_s17  ;;  %s139_s7 = smov 28   ;;  %s140_s8 = smov 24   ;;  %v111_v11 = vld [vmem:[%s207_s0 + $0x5] sm:$0x1]   ;;  %v112_v12 = vld [vmem:[%s207_s0 + $0x4] sm:$0x1]  }
   0x7   :  { %s141_s13 = smov 20   ;;  %s142_s14 = smov 16   ;;  %v113_v13 = vld [vmem:[%s207_s0 + $0x3] sm:$0x1]   ;;  %v114_v14 = vld [vmem:[%s207_s0 + $0x2] sm:$0x1]  }
   0x8   :  { %s143_s19 = smov 12   ;;  %s144_s20 = smov 8   ;;  %v115_v15 = vld [vmem:[%s207_s0 + $0x1] sm:$0x1]   ;;  %vm27_vm4 = vcmask 425344   ;;  %vm33_vm5 = vcmask 392544  }
   0x9   :  { %s145_s0 = smov 4   ;;  %vm39_vm6 = vcmask 359744   ;;  %vm45_vm7 = vcmask 326944   ;;  %vm51_vm8 = vcmask 294144   ;;  %vm57_vm9 = vcmask 261344  }
   0xa   :  { %31 = vrot.lane.b32.xlu0 %v105_v4, %s135_s24  ;;  %37 = vrot.lane.b32.xlu1 %v106_v5, %s136_s25  ;;  %vm63_vm10 = vcmask 228544   ;;  %vm69_vm11 = vcmask 195744   ;;  %vm75_vm12 = vcmask 162944   ;;  %vm81_vm13 = vcmask 130144  }
   0xb   :  { %vm87_vm14 = vcmask 97344   ;;  %vm93_vm15 = vcmask 64544  }
   0xe   :  { %43 = vrot.lane.b32.xlu0 %v107_v7, %s137_s30  ;;  %49 = vrot.lane.b32.xlu1 %v108_v8, %s138_s2 }
  0x12   :  { %55 = vrot.lane.b32.xlu0 %v109_v9, %s139_s7  ;;  %61 = vrot.lane.b32.xlu1 %v110_v10, %s140_s8 }
  0x16   :  { %67 = vrot.lane.b32.xlu0 %v111_v11, %s141_s13  ;;  %73 = vrot.lane.b32.xlu1 %v112_v12, %s142_s14 }
  0x1a   :  { %79 = vrot.lane.b32.xlu0 %v113_v13, %s143_s19  ;;  %85 = vrot.lane.b32.xlu1 %v114_v14, %s144_s20 }
  0x1e   :  { %91 = vrot.lane.b32.xlu0 %v115_v15, %s145_s0 }
  0x74   :  { %v8_v16 = vpop.permute.xlu0 %7   ;;  %v20_v17 = vpop.permute.xlu1 %19  }
  0x75   :  { %10 = vst.msk [vmem:[#allocation0] sm:$0x1] %vm9_vm1, %v8_v16  }
  0x78   :  { %v14_v18 = vpop.permute.xlu0 %13   ;;  %v26_v19 = vpop.permute.xlu1 %25  }
  0x79   :  { %16 = vst.msk [vmem:[#allocation0] sm:$0x1] %vm15_vm2, %v14_v18  }
  0x7a   :  { %22 = vst.msk [vmem:[#allocation0] sm:$0x1] %vm21_vm3, %v20_v17  }
  0x7b   :  { %28 = vst.msk [vmem:[#allocation0] sm:$0x1] %vm27_vm4, %v26_v19  }
  0x7c   :  { %v32_v20 = vpop.permute.xlu0 %31   ;;  %v38_v21 = vpop.permute.xlu1 %37  }
  0x7d   :  { %34 = vst.msk [vmem:[#allocation0] sm:$0x1] %vm33_vm5, %v32_v20  }
  0x7e   :  { %40 = vst.msk [vmem:[#allocation0] sm:$0x1] %vm39_vm6, %v38_v21  }
  0x80   :  { %v44_v22 = vpop.permute.xlu0 %43   ;;  %v50_v23 = vpop.permute.xlu1 %49  }
  0x81   :  { %46 = vst.msk [vmem:[#allocation0] sm:$0x1] %vm45_vm7, %v44_v22  }
  0x82   :  { %52 = vst.msk [vmem:[#allocation0] sm:$0x1] %vm51_vm8, %v50_v23  }
  0x84   :  { %v56_v24 = vpop.permute.xlu0 %55   ;;  %v62_v25 = vpop.permute.xlu1 %61  }
  0x85   :  { %58 = vst.msk [vmem:[#allocation0] sm:$0x1] %vm57_vm9, %v56_v24  }
  0x86   :  { %64 = vst.msk [vmem:[#allocation0] sm:$0x1] %vm63_vm10, %v62_v25  }
  0x88   :  { %v68_v26 = vpop.permute.xlu0 %67   ;;  %v74_v27 = vpop.permute.xlu1 %73  }
  0x89   :  { %70 = vst.msk [vmem:[#allocation0] sm:$0x1] %vm69_vm11, %v68_v26  }
  0x8a   :  { %76 = vst.msk [vmem:[#allocation0] sm:$0x1] %vm75_vm12, %v74_v27  }
  0x8c   :  { %v80_v28 = vpop.permute.xlu0 %79   ;;  %v86_v29 = vpop.permute.xlu1 %85  }
  0x8d   :  { %82 = vst.msk [vmem:[#allocation0] sm:$0x1] %vm81_vm13, %v80_v28  }
  0x8e   :  { %88 = vst.msk [vmem:[#allocation0] sm:$0x1] %vm87_vm14, %v86_v29  }
  0x90   :  { %v92_v30 = vpop.permute.xlu0 %91  }
  0x91   :  { %94 = vst.msk [vmem:[#allocation0] sm:$0x1] %vm93_vm15, %v92_v30  }
  0x98   :  { %v98_v31 = vld [vmem:[#allocation0] sm:$0x1] }
  0x99   :  { %100 = vst [vmem:[%s208_s1] sm:$0x1] %v98_v31 }

// kernel: basic_block_forward.2
= control target key start
LH: loop header
LB: loop body
LE: loop exit
PB: predicated region body
PF: predicated region fallthrough
CT: control target
= control target key end

     0   :  { %s685_s15 = smov 0   ;;  %s776_s0 = inlined_call_operand.vmem [shape: f32[2,16,64], index: 0, kind: input, shape index: {}]   ;;  %s777_s1 = inlined_call_operand.vmem [shape: f32[1,64], index: 1, kind: input, shape index: {}]   ;;  %s778_s2 = inlined_call_operand.vmem [shape: f32[1,64], index: 2, kind: input, shape index: {}]   ;;  %s779_s3 = inlined_call_operand.vmem [shape: bf16[3,64,128], index: 3, kind: input, shape index: {}]   ;;  %s780_s4 = inlined_call_operand.vmem [shape: f32[2,16,128], index: 4, kind: output, shape index: {}]  }
   0x1 LB: > { %s525_s16 = sadd.s32 4294967295, %s656_s15   ;;  %p529_p0 = scmp.ge.s32.totalorder %s656_s15, 1  ;;  %s656_s15 = sphi %s685_s15, %s14_s15  }
   0x2   : > { %p162_p1 = scmp.lt.s32.totalorder %s656_s15, 3 }
   0x4   : > { %p163_p2 = pnand %p529_p0, %p162_p1 }
   0x5   : > { %v638_v0 = vld [vmem:[%s779_s3] sm:$0xff] (!%p163_p2)   ;;  %v658_v1 = vmov (!%p163_p2), 0.0   ;;  %v639_v2 = vld [vmem:[%s779_s3 + $0x8] sm:$0xff] (!%p163_p2)   ;;  %vm659_vm0 = vmmov (!%p163_p2), 0   ;;  %p188_p3 = scmp.lt.s32.totalorder (!%p163_p2), %s525_s16, 1  ;;  %vm221_vm1 = vcmask (!%p163_p2), 516096  }
   0x6   : > { %166 = sbr.rel (%p163_p2) target bundleno = 266 (0x10a), region = 36  ;;  %598 = vmatprep.subr.bf16.mxu0 (!%p163_p2), %v658_v1  ;;  %586 = vmatprep.subr.bf16.mxu1 (!%p163_p2), %v658_v1  ;;  %v642_v3 = vld [vmem:[%s779_s3 + $0x20] sm:$0xff] (!%p163_p2)   ;;  %222 = vst.msk [vmem:[#allocation2] sm:$0x1] (!%p163_p2), %vm221_vm1, %v658_v1  ;;  %223 = vst.msk [vmem:[#allocation2 + $0x11] sm:$0x1] (!%p163_p2), %vm221_vm1, %v658_v1 }
   0x7   : > { %599 = vmatpush3.bf16.msra.mxu0 (!%p163_p2), %v638_v0  ;;  %606 = vmatprep.mubr.msk.bf16.mxu0 (!%p163_p2), %vm659_vm0, %v658_v1  ;;  %v640_v4 = vld [vmem:[%s779_s3 + $0x10] sm:$0xff] (!%p163_p2)   ;;  %v534_v5 = vld [vmem:[%s777_s1] ss:$0 sm:$0xff] (!%p163_p2)  ;;  %v644_v7 = vld [vmem:[%s779_s3 + $0x28] sm:$0xff] (!%p163_p2)   ;;  %vm224_vm2 = vcmask (!%p163_p2), 523264  }
   0x8   : > { %600 = vmatprep.subr.bf16.mxu0 (!%p163_p2), %v658_v1  ;;  %594 = vmatprep.mubr.msk.bf16.mxu1 (!%p163_p2), %vm659_vm0, %v658_v1  ;;  %v535_v6 = vld [vmem:[%s778_s2] ss:$0 sm:$0xff] (!%p163_p2)  ;;  %v641_v10 = vld [vmem:[%s779_s3 + $0x18] sm:$0xff] (!%p163_p2)   ;;  %v646_v13 = vld [vmem:[%s779_s3 + $0x30] sm:$0xff] (!%p163_p2)  }
   0x9   : > { %587 = vmatpush3.bf16.msra.mxu1 (!%p163_p2), %v642_v3  ;;  %v648_v18 = vld [vmem:[%s779_s3 + $0x38] sm:$0xff] (!%p163_p2)   ;;  %v643_v19 = vld [vmem:[%s779_s3 + $0x40] sm:$0xff] (!%p163_p2)   ;;  %v645_v26 = vld [vmem:[%s779_s3 + $0x48] sm:$0xff] (!%p163_p2)  }
   0xa   : > { %588 = vmatprep.subr.bf16.mxu1 (!%p163_p2), %v658_v1  ;;  %v647_v27 = vld [vmem:[%s779_s3 + $0x50] sm:$0xff] (!%p163_p2)   ;;  %v649_v28 = vld [vmem:[%s779_s3 + $0x58] sm:$0xff] (!%p163_p2)  }
   0xb   : > { %601 = vmatpush3.bf16.msra.mxu0 (!%p163_p2), %v639_v2 }
   0xc   : > { %602 = vmatprep.subr.bf16.mxu0 (!%p163_p2), %v658_v1 }
   0xd   : > { %s782_s16 = smov (!%p188_p3, %s525_s16), 1  ;;  %589 = vmatpush3.bf16.msra.mxu1 %v644_v7 }
   0xe   : > { %s569_s27 = sshll.u32 %s782_s16, 4  ;;  %590 = vmatprep.subr.bf16.mxu1 %v658_v1 }
   0xf   : > { %s192_s8 = scalar_lea.vmem %s776_s0, %s569_s27  ;;  %603 = vmatpush3.bf16.msra.mxu0 %v640_v4  ;;  %s197_s28 = scalar_lea.vmem %s780_s4, %s569_s27 }
  0x10   : > { %v199_v8 = vld [vmem:[%s192_s8] sm:$0xff]  ;;  %v200_v9 = vld [vmem:[%s192_s8 + $0x8] sm:$0xff]  ;;  %604 = vmatprep.subr.bf16.mxu0 %v658_v1 }
  0x11   : > { %v208_v11 = vmul.f32 %v534_v5, %v199_v8  ;;  %v209_v12 = vmul.f32 %v534_v5, %v200_v9  ;;  %591 = vmatpush3.bf16.msra.mxu1 %v646_v13 }
  0x12   : > { %592 = vmatprep.subr.bf16.mxu1 %v658_v1 }
  0x13   : > { %v217_v14 = vadd.f32 %v535_v6, %v208_v11  ;;  %v218_v15 = vadd.f32 %v535_v6, %v209_v12  ;;  %605 = vmatpush3.bf16.msra.mxu0 %v641_v10 }
  0x14   : > { %610 = vmatprep.subr.bf16.mxu0 %v658_v1 }
  0x15   : > { %v219_v16 = vmax.f32 %v217_v14, 0.0  ;;  %v220_v17 = vmax.f32 %v218_v15, 0.0  ;;  %593 = vmatpush3.bf16.msra.mxu1 %v648_v18 }
  0x17   : > { %225 = vst.msk [vmem:[#allocation2 + $0x1] sm:$0xff] %vm224_vm2, %v219_v16  ;;  %226 = vst.msk [vmem:[#allocation2 + $0x9] sm:$0xff] %vm224_vm2, %v220_v17 }
  0x1e   : > { %v227_v20 = vld [vmem:[#allocation2] sm:$0xff]  ;;  %v228_v21 = vld [vmem:[#allocation2 + $0x8] sm:$0xff] }
  0x1f   : > { %v238_v22 = vld [vmem:[#allocation2 + $0x1] sm:$0xff]  ;;  %v229_v23 = vpack.c.bf16 %v228_v21, %v227_v20  ;;  %v239_v24 = vld [vmem:[#allocation2 + $0x9] sm:$0xff] }
  0x20   : > { %v240_v25 = vpack.c.bf16 %v239_v24, %v238_v22  ;;  %v386_v29 = vld [vmem:[#allocation2 + $0x2] sm:$0xff]  ;;  %v387_v30 = vld [vmem:[#allocation2 + $0xa] sm:$0xff] }
  0x21   : > { %607 = vmatmul.mubr.msk.bf16.vlgmr.msra.gmra.mrb[0].mxu0 %vm224_vm2, %v229_v23  ;;  %v388_v31 = vpack.c.bf16 %v387_v30, %v386_v29 }
  0x22   : > { %611 = vmatpush3.bf16.msra.mxu0 %v643_v19  ;;  %595 = vmatmul.mubr.msk.bf16.vlgmr.msra.gmra.mrb[0].mxu1 %vm224_vm2, %v240_v25 }
  0x23   : > { %612 = vmatprep.subr.bf16.mxu0 %v658_v1  ;;  %618 = vmatprep.mubr.msk.bf16.mxu0 %vm659_vm0, %v658_v1 }
  0x26   : > { %613 = vmatpush3.bf16.msra.mxu0 %v645_v26 }
  0x27   : > { %614 = vmatprep.subr.bf16.mxu0 %v658_v1 }
  0x2a   : > { %615 = vmatpush3.bf16.msra.mxu0 %v647_v27 }
  0x2b   : > { %616 = vmatprep.subr.bf16.mxu0 %v658_v1 }
  0x2e   : > { %617 = vmatpush3.bf16.msra.mxu0 %v649_v28 }
  0x31   : > { %619 = vmatmul.mubr.msk.bf16.vlgmr.msra.gmra.mrb[0].mxu0 %vm224_vm2, %v388_v31 }
  0xf5   : > { %v311_v32 = vpop.f32.mrb[0].mxu1 }
  0xf6   : > { %v596_v33 = vpop.f32.mrb[1].mxu1 }
  0xf7   : > { %v314_v34 = vpop.f32.mrb[2].mxu1 }
  0xf8   : > { %v597_v35 = vpop.f32.mrb[3].mxu1 }
 0x104   : > { %v459_v36 = vpop.f32.mrb[0].mxu0 }
 0x105   : > { %v622_v37 = vadd.f32 %v459_v36, %v311_v32  ;;  %v620_v38 = vpop.f32.mrb[1].mxu0 }
 0x106   : > { %v462_v39 = vpop.f32.mrb[2].mxu0 }
 0x107   : > { %468 = vst [vmem:[%s197_s28] sm:$0xff] %v622_v37  ;;  %v623_v40 = vadd.f32 %v462_v39, %v314_v34  ;;  %v621_v41 = vpop.f32.mrb[3].mxu0 }
 0x109   : > { %469 = vst [vmem:[%s197_s28 + $0x8] sm:$0xff] %v623_v40 }
 0x10a PF: > { %s14_s15 = sadd.s32 1, %s656_s15  }
 0x10b   : > { %p11_p4 = scmp.ge.s32.totalorder %s14_s15, 4  }
 0x10d   :  { %13 = sbr.rel (!%p11_p4) target bundleno = 1 (0x1), region = 68 }

// kernel: tile.34
= control target key start
LH: loop header
LB: loop body
LE: loop exit
PB: predicated region body
PF: predicated region fallthrough
CT: control target
= control target key end

     0   :  { %s131_s10 = smov 120   ;;  %s132_s11 = smov 104   ;;  %vm3_vm0 = vcmask 64512   ;;  %vm9_vm1 = vcmask 1048512   ;;  %vm15_vm2 = vcmask 982912   ;;  %vm21_vm3 = vcmask 917312   ;;  %s207_s0 = inlined_call_operand.vmem [shape: f32[16,8], index: 0, kind: input, shape index: {}]   ;;  %s208_s1 = inlined_call_operand.vmem [shape: f32[1,128], index: 1, kind: output, shape index: {}]  }
   0x1   :  { %v101_v0 = vld [vmem:[%s207_s0 + $0xf] sm:$0x1]   ;;  %v103_v1 = vld [vmem:[%s207_s0 + $0xd] sm:$0x1]   ;;  %v102_v2 = vld [vmem:[%s207_s0 + $0xe] sm:$0x1]  }
   0x2   :  { %7 = vrot.lane.b32.xlu0 %v101_v0, %s131_s10  ;;  %19 = vrot.lane.b32.xlu1 %v103_v1, %s132_s11  ;;  %v104_v3 = vld [vmem:[%s207_s0 + $0xc] sm:$0x1]   ;;  %s133_s16 = smov 112   ;;  %s134_s17 = smov 96   ;;  %v105_v4 = vld [vmem:[%s207_s0 + $0xb] sm:$0x1]  }
   0x3   :  { %v106_v5 = vld [vmem:[%s207_s0 + $0xa] sm:$0x1]   ;;  %v2_v6 = vld [vmem:[%s207_s0] sm:$0x1]   ;;  %s135_s24 = smov 88   ;;  %s136_s25 = smov 80  }
   0x4   :  { %4 = vst.msk [vmem:[#allocation0] sm:$0x1] %vm3_vm0, %v2_v6   ;;  %v107_v7 = vld [vmem:[%s207_s0 + $0x9] sm:$0x1]   ;;  %v108_v8 = vld [vmem:[%s207_s0 + $0x8] sm:$0x1]  }
   0x5   :  { %s137_s30 = smov 72   ;;  %s138_s2 = smov 64   ;;  %v109_v9 = vld [vmem:[%s207_s0 + $0x7] sm:$0x1]   ;;  %v110_v10 = vld [vmem:[%s207_s0 + $0x6] sm:$0x1]  }
   0x6   :  { %13 = vrot.lane.b32.xlu0 %v102_v2, %s133_s16  ;;  %25 = vrot.lane.b32.xlu1 %v104_v3, %s134_s17  ;;  %s139_s7 = smov 56   ;;  %s140_s8 = smov 48   ;;  %v111_v11 = vld [vmem:[%s207_s0 + $0x5] sm:$0x1]   ;;  %v112_v12 = vld [vmem:[%s207_s0 + $0x4] sm:$0x1]  }
   0x7   :  { %s141_s13 = smov 40   ;;  %s142_s14 = smov 32   ;;  %v113_v13 = vld [vmem:[%s207_s0 + $0x3] sm:$0x1]   ;;  %v114_v14 = vld [vmem:[%s207_s0 + $0x2] sm:$0x1]  }
   0x8   :  { %s143_s19 = smov 24   ;;  %s144_s20 = smov 16   ;;  %v115_v15 = vld [vmem:[%s207_s0 + $0x1] sm:$0x1]   ;;  %vm27_vm4 = vcmask 851712   ;;  %vm33_vm5 = vcmask 786112  }
   0x9   :  { %s145_s0 = smov 8   ;;  %vm39_vm6 = vcmask 720512   ;;  %vm45_vm7 = vcmask 654912   ;;  %vm51_vm8 = vcmask 589312   ;;  %vm57_vm9 = vcmask 523712  }
   0xa   :  { %31 = vrot.lane.b32.xlu0 %v105_v4, %s135_s24  ;;  %37 = vrot.lane.b32.xlu1 %v106_v5, %s136_s25  ;;  %vm63_vm10 = vcmask 458112   ;;  %vm69_vm11 = vcmask 392512   ;;  %vm75_vm12 = vcmask 326912   ;;  %vm81_vm13 = vcmask 261312  }
   0xb   :  { %vm87_vm14 = vcmask 195712   ;;  %vm93_vm15 = vcmask 130112  }
   0xe   :  { %43 = vrot.lane.b32.xlu0 %v107_v7, %s137_s30  ;;  %49 = vrot.lane.b32.xlu1 %v108_v8, %s138_s2 }
  0x12   :  { %55 = vrot.lane.b32.xlu0 %v109_v9, %s139_s7  ;;  %61 = vrot.lane.b32.xlu1 %v110_v10, %s140_s8 }
  0x16   :  { %67 = vrot.lane.b32.xlu0 %v111_v11, %s141_s13  ;;  %73 = vrot.lane.b32.xlu1 %v112_v12, %s142_s14 }
  0x1a   :  { %79 = vrot.lane.b32.xlu0 %v113_v13, %s143_s19  ;;  %85 = vrot.lane.b32.xlu1 %v114_v14, %s144_s20 }
  0x1e   :  { %91 = vrot.lane.b32.xlu0 %v115_v15, %s145_s0 }
  0x74   :  { %v8_v16 = vpop.permute.xlu0 %7   ;;  %v20_v17 = vpop.permute.xlu1 %19  }
  0x75   :  { %10 = vst.msk [vmem:[#allocation0] sm:$0x1] %vm9_vm1, %v8_v16  }
  0x78   :  { %v14_v18 = vpop.permute.xlu0 %13   ;;  %v26_v19 = vpop.permute.xlu1 %25  }
  0x79   :  { %16 = vst.msk [vmem:[#allocation0] sm:$0x1] %vm15_vm2, %v14_v18  }
  0x7a   :  { %22 = vst.msk [vmem:[#allocation0] sm:$0x1] %vm21_vm3, %v20_v17  }
  0x7b   :  { %28 = vst.msk [vmem:[#allocation0] sm:$0x1] %vm27_vm4, %v26_v19  }
  0x7c   :  { %v32_v20 = vpop.permute.xlu0 %31   ;;  %v38_v21 = vpop.permute.xlu1 %37  }
  0x7d   :  { %34 = vst.msk [vmem:[#allocation0] sm:$0x1] %vm33_vm5, %v32_v20  }
  0x7e   :  { %40 = vst.msk [vmem:[#allocation0] sm:$0x1] %vm39_vm6, %v38_v21  }
  0x80   :  { %v44_v22 = vpop.permute.xlu0 %43   ;;  %v50_v23 = vpop.permute.xlu1 %49  }
  0x81   :  { %46 = vst.msk [vmem:[#allocation0] sm:$0x1] %vm45_vm7, %v44_v22  }
  0x82   :  { %52 = vst.msk [vmem:[#allocation0] sm:$0x1] %vm51_vm8, %v50_v23  }
  0x84   :  { %v56_v24 = vpop.permute.xlu0 %55   ;;  %v62_v25 = vpop.permute.xlu1 %61  }
  0x85   :  { %58 = vst.msk [vmem:[#allocation0] sm:$0x1] %vm57_vm9, %v56_v24  }
  0x86   :  { %64 = vst.msk [vmem:[#allocation0] sm:$0x1] %vm63_vm10, %v62_v25  }
  0x88   :  { %v68_v26 = vpop.permute.xlu0 %67   ;;  %v74_v27 = vpop.permute.xlu1 %73  }
  0x89   :  { %70 = vst.msk [vmem:[#allocation0] sm:$0x1] %vm69_vm11, %v68_v26  }
  0x8a   :  { %76 = vst.msk [vmem:[#allocation0] sm:$0x1] %vm75_vm12, %v74_v27  }
  0x8c   :  { %v80_v28 = vpop.permute.xlu0 %79   ;;  %v86_v29 = vpop.permute.xlu1 %85  }
  0x8d   :  { %82 = vst.msk [vmem:[#allocation0] sm:$0x1] %vm81_vm13, %v80_v28  }
  0x8e   :  { %88 = vst.msk [vmem:[#allocation0] sm:$0x1] %vm87_vm14, %v86_v29  }
  0x90   :  { %v92_v30 = vpop.permute.xlu0 %91  }
  0x91   :  { %94 = vst.msk [vmem:[#allocation0] sm:$0x1] %vm93_vm15, %v92_v30  }
  0x98   :  { %v98_v31 = vld [vmem:[#allocation0] sm:$0x1] }
  0x99   :  { %100 = vst [vmem:[%s208_s1] sm:$0x1] %v98_v31 }

// kernel: basic_block_forward.3
= control target key start
LH: loop header
LB: loop body
LE: loop exit
PB: predicated region body
PF: predicated region fallthrough
CT: control target
= control target key end

     0   :  { %s1054_s21 = smov 0   ;;  %s1207_s0 = inlined_call_operand.vmem [shape: f32[2,16,128], index: 0, kind: input, shape index: {}]   ;;  %s1208_s1 = inlined_call_operand.vmem [shape: f32[2,16,64], index: 1, kind: input, shape index: {}]   ;;  %s1209_s2 = inlined_call_operand.vmem [shape: f32[1,128], index: 2, kind: input, shape index: {}]   ;;  %s1210_s3 = inlined_call_operand.vmem [shape: f32[1,128], index: 3, kind: input, shape index: {}]   ;;  %s1211_s4 = inlined_call_operand.vmem [shape: bf16[3,128,128], index: 4, kind: input, shape index: {}]   ;;  %s1212_s5 = inlined_call_operand.vmem [shape: bf16[64,128], index: 5, kind: input, shape index: {}]   ;;  %s1213_s6 = inlined_call_operand.vmem [shape: f32[2,16,128], index: 6, kind: output, shape index: {}]  }
   0x1 LB: > { %s778_s22 = sadd.s32 4294967295, %s1015_s21   ;;  %p782_p0 = scmp.ge.s32.totalorder %s1015_s21, 1  ;;  %s1015_s21 = sphi %s1054_s21, %s16_s21  }
   0x2   : > { %p222_p1 = scmp.lt.s32.totalorder %s1015_s21, 3 }
   0x4   : > { %p223_p2 = pnand %p782_p0, %p222_p1 }
   0x5   : > { %v981_v0 = vld [vmem:[%s1211_s4] sm:$0xff] (!%p223_p2)   ;;  %v1017_v1 = vmov (!%p223_p2), 0.0   ;;  %v983_v3 = vld [vmem:[%s1211_s4 + $0x8] sm:$0xff] (!%p223_p2)   ;;  %vm1018_vm0 = vmmov (!%p223_p2), 0   ;;  %p257_p3 = scmp.lt.s32.totalorder (!%p223_p2), %s778_s22, 1  ;;  %v985_v5 = vld [vmem:[%s1211_s4 + $0x10] sm:$0xff] (!%p223_p2)  }
   0x6   : > { %226 = sbr.rel (%p223_p2) target bundleno = 288 (0x120), region = 44  ;;  %889 = vmatprep.subr.bf16.mxu1 (!%p223_p2), %v1017_v1  ;;  %295 = vst [vmem:[#allocation2] sm:$0x1] (!%p223_p2), %v1017_v1  ;;  %296 = vst [vmem:[#allocation2 + $0x11] sm:$0x1] (!%p223_p2), %v1017_v1  ;;  %921 = vmatprep.subr.bf16.mxu0 (!%p223_p2), %v1017_v1  ;;  %v982_v2 = vld [vmem:[%s1211_s4 + $0x40] sm:$0xff] (!%p223_p2)  }
   0x7   : > { %890 = vmatpush3.bf16.msra.mxu1 (!%p223_p2), %v981_v0  ;;  %905 = vmatprep.mubr.msk.bf16.mxu1 (!%p223_p2), %vm1018_vm0, %v1017_v1  ;;  %v984_v4 = vld [vmem:[%s1211_s4 + $0x48] sm:$0xff] (!%p223_p2)   ;;  %v986_v6 = vld [vmem:[%s1211_s4 + $0x50] sm:$0xff] (!%p223_p2)   ;;  %v987_v7 = vld [vmem:[%s1211_s4 + $0x18] sm:$0xff] (!%p223_p2)   ;;  %vm442_vm1 = vcmask (!%p223_p2), 523264  }
   0x8   : > { %922 = vmatpush3.bf16.msra.mxu0 (!%p223_p2), %v982_v2  ;;  %891 = vmatprep.subr.bf16.mxu1 (!%p223_p2), %v1017_v1  ;;  %v988_v8 = vld [vmem:[%s1211_s4 + $0x58] sm:$0xff] (!%p223_p2)   ;;  %v989_v9 = vld [vmem:[%s1211_s4 + $0x20] sm:$0xff] (!%p223_p2)   ;;  %v991_v17 = vld [vmem:[%s1211_s4 + $0x28] sm:$0xff] (!%p223_p2)  }
   0x9   : > { %923 = vmatprep.subr.bf16.mxu0 (!%p223_p2), %v1017_v1  ;;  %937 = vmatprep.mubr.msk.bf16.mxu0 (!%p223_p2), %vm1018_vm0, %v1017_v1  ;;  %v990_v10 = vld [vmem:[%s1211_s4 + $0x60] sm:$0xff] (!%p223_p2)   ;;  %v992_v18 = vld [vmem:[%s1211_s4 + $0x68] sm:$0xff] (!%p223_p2)   ;;  %v993_v21 = vld [vmem:[%s1211_s4 + $0x30] sm:$0xff] (!%p223_p2)  }
   0xa   : > { %v789_v13 = vld [vmem:[%s1209_s2] ss:$0 sm:$0xff] (!%p223_p2)  ;;  %v994_v24 = vld [vmem:[%s1211_s4 + $0x70] sm:$0xff] (!%p223_p2)   ;;  %v995_v25 = vld [vmem:[%s1211_s4 + $0x38] sm:$0xff] (!%p223_p2)  }
   0xb   : > { %892 = vmatpush3.bf16.msra.mxu1 (!%p223_p2), %v983_v3  ;;  %v790_v16 = vld [vmem:[%s1210_s3] ss:$0 sm:$0xff] (!%p223_p2)  ;;  %v996_v26 = vld [vmem:[%s1211_s4 + $0x78] sm:$0xff] (!%p223_p2)   ;;  %v999_v33 = vld [vmem:[%s1212_s5 + $0x8] sm:$0xff] (!%p223_p2)  }
   0xc   : > { %924 = vmatpush3.bf16.msra.mxu0 (!%p223_p2), %v984_v4  ;;  %893 = vmatprep.subr.bf16.mxu1 (!%p223_p2), %v1017_v1  ;;  %v997_v29 = vld [vmem:[%s1212_s5] sm:$0xff] (!%p223_p2)   ;;  %v1000_v34 = vld [vmem:[%s1211_s4 + $0x88] sm:$0xff] (!%p223_p2)   ;;  %v1001_v35 = vld [vmem:[%s1212_s5 + $0x10] sm:$0xff] (!%p223_p2)  }
   0xd   : > { %s1215_s22 = smov (!%p257_p3, %s778_s22), 1  ;;  %925 = vmatprep.subr.bf16.mxu0 %v1017_v1  ;;  %v998_v32 = vld [vmem:[%s1211_s4 + $0x80] sm:$0xff]   ;;  %v1002_v36 = vld [vmem:[%s1211_s4 + $0x90] sm:$0xff]   ;;  %v1003_v37 = vld [vmem:[%s1212_s5 + $0x18] sm:$0xff]  }
   0xe   : > { %s1095_s13 = sshll.u32 %s1215_s22, 4  ;;  %v1004_v40 = vld [vmem:[%s1211_s4 + $0x98] sm:$0xff]   ;;  %v1005_v42 = vld [vmem:[%s1211_s4 + $0xa0] sm:$0xff]   ;;  %v1006_v43 = vld [vmem:[%s1211_s4 + $0xa8] sm:$0xff]  }
   0xf   : > { %894 = vmatpush3.bf16.msra.mxu1 %v985_v5  ;;  %s261_s18 = scalar_lea.vmem %s1207_s0, %s1095_s13  ;;  %s266_s8 = scalar_lea.vmem %s1208_s1, %s1095_s13  ;;  %v1007_v44 = vld [vmem:[%s1211_s4 + $0xb0] sm:$0xff]   ;;  %v1008_v45 = vld [vmem:[%s1211_s4 + $0xb8] sm:$0xff]  }
  0x10   : > { %926 = vmatpush3.bf16.msra.mxu0 %v986_v6  ;;  %895 = vmatprep.subr.bf16.mxu1 %v1017_v1  ;;  %v273_v11 = vld [vmem:[%s261_s18] sm:$0xff]  ;;  %v274_v12 = vld [vmem:[%s261_s18 + $0x8] sm:$0xff]  ;;  %s271_s25 = scalar_lea.vmem %s1213_s6, %s1095_s13 }
  0x11   : > { %927 = vmatprep.subr.bf16.mxu0 %v1017_v1  ;;  %v282_v14 = vmul.f32 %v789_v13, %v273_v11  ;;  %v283_v15 = vmul.f32 %v789_v13, %v274_v12  ;;  %v299_v38 = vld [vmem:[%s266_s8] sm:$0xff]  ;;  %v300_v39 = vld [vmem:[%s266_s8 + $0x8] sm:$0xff] }
  0x12   : > { %v301_v41 = vpack.c.bf16 %v300_v39, %v299_v38 }
  0x13   : > { %896 = vmatpush3.bf16.msra.mxu1 %v987_v7  ;;  %v291_v19 = vadd.f32 %v790_v16, %v282_v14  ;;  %v292_v20 = vadd.f32 %v790_v16, %v283_v15 }
  0x14   : > { %928 = vmatpush3.bf16.msra.mxu0 %v988_v8  ;;  %897 = vmatprep.subr.bf16.mxu1 %v1017_v1 }
  0x15   : > { %929 = vmatprep.subr.bf16.mxu0 %v1017_v1  ;;  %v293_v22 = vmax.f32 %v291_v19, 0.0  ;;  %v294_v23 = vmax.f32 %v292_v20, 0.0 }
  0x17   : > { %898 = vmatpush3.bf16.msra.mxu1 %v989_v9  ;;  %297 = vst [vmem:[#allocation2 + $0x1] sm:$0xff] %v293_v22  ;;  %298 = vst [vmem:[#allocation2 + $0x9] sm:$0xff] %v294_v23  ;;  %v489_v30 = vpack.c.bf16 %v294_v23, %v293_v22 }
  0x18   : > { %930 = vmatpush3.bf16.msra.mxu0 %v990_v10  ;;  %899 = vmatprep.subr.bf16.mxu1 %v1017_v1 }
  0x19   : > { %931 = vmatprep.subr.bf16.mxu0 %v1017_v1 }
  0x1b   : > { %900 = vmatpush3.bf16.msra.mxu1 %v991_v17 }
  0x1c   : > { %932 = vmatpush3.bf16.msra.mxu0 %v992_v18  ;;  %901 = vmatprep.subr.bf16.mxu1 %v1017_v1 }
  0x1d   : > { %933 = vmatprep.subr.bf16.mxu0 %v1017_v1 }
  0x1e   : > { %v310_v27 = vld [vmem:[#allocation2] sm:$0xff]  ;;  %v311_v28 = vld [vmem:[#allocation2 + $0x8] sm:$0xff] }
  0x1f   : > { %902 = vmatpush3.bf16.msra.mxu1 %v993_v21  ;;  %v312_v31 = vpack.c.bf16 %v311_v28, %v310_v27  ;;  %v598_v46 = vld [vmem:[#allocation2 + $0x2] sm:$0xff]  ;;  %v599_v47 = vld [vmem:[#allocation2 + $0xa] sm:$0xff] }
  0x20   : > { %934 = vmatpush3.bf16.msra.mxu0 %v994_v24  ;;  %903 = vmatprep.subr.bf16.mxu1 %v1017_v1  ;;  %v600_v48 = vpack.c.bf16 %v599_v47, %v598_v46 }
  0x21   : > { %935 = vmatprep.subr.bf16.mxu0 %v1017_v1 }
  0x23   : > { %904 = vmatpush3.bf16.msra.mxu1 %v995_v25 }
  0x24   : > { %936 = vmatpush3.bf16.msra.mxu0 %v996_v26  ;;  %909 = vmatprep.subr.bf16.mxu1 %v1017_v1 }
  0x25   : > { %941 = vmatprep.subr.bf16.mxu0 %v1017_v1 }
  0x26   : > { %906 = vmatmul.mubr.bf16.vlgmr.msra.gmra.mrb[0].mxu1 %v312_v31 }
  0x27   : > { %910 = vmatpush3.bf16.msra.mxu1 %v997_v29  ;;  %938 = vmatmul.mubr.bf16.vlgmr.msra.gmra.mrb[0].mxu0 %v489_v30 }
  0x28   : > { %942 = vmatpush3.bf16.msra.mxu0 %v998_v32  ;;  %911 = vmatprep.subr.bf16.mxu1 %v1017_v1 }
  0x29   : > { %943 = vmatprep.subr.bf16.mxu0 %v1017_v1  ;;  %917 = vmatprep.mubr.msk.bf16.mxu1 %vm1018_vm0, %v1017_v1 }
  0x2a   : > { %957 = vmatprep.mubr.msk.bf16.mxu0 %vm1018_vm0, %v1017_v1 }
  0x2b   : > { %912 = vmatpush3.bf16.msra.mxu1 %v999_v33 }
  0x2c   : > { %944 = vmatpush3.bf16.msra.mxu0 %v1000_v34  ;;  %913 = vmatprep.subr.bf16.mxu1 %v1017_v1 }
  0x2d   : > { %945 = vmatprep.subr.bf16.mxu0 %v1017_v1 }
  0x2f   : > { %914 = vmatpush3.bf16.msra.mxu1 %v1001_v35 }
  0x30   : > { %946 = vmatpush3.bf16.msra.mxu0 %v1002_v36  ;;  %915 = vmatprep.subr.bf16.mxu1 %v1017_v1 }
  0x31   : > { %947 = vmatprep.subr.bf16.mxu0 %v1017_v1 }
  0x33   : > { %916 = vmatpush3.bf16.msra.mxu1 %v1003_v37 }
  0x34   : > { %948 = vmatpush3.bf16.msra.mxu0 %v1004_v40 }
  0x35   : > { %949 = vmatprep.subr.bf16.mxu0 %v1017_v1 }
  0x36   : > { %918 = vmatmul.mubr.msk.bf16.vlgmr.msra.gmra.mrb[0].mxu1 %vm442_vm1, %v301_v41 }
  0x38   : > { %950 = vmatpush3.bf16.msra.mxu0 %v1005_v42 }
  0x39   : > { %951 = vmatprep.subr.bf16.mxu0 %v1017_v1 }
  0x3c   : > { %952 = vmatpush3.bf16.msra.mxu0 %v1006_v43 }
  0x3d   : > { %953 = vmatprep.subr.bf16.mxu0 %v1017_v1 }
  0x40   : > { %954 = vmatpush3.bf16.msra.mxu0 %v1007_v44 }
  0x41   : > { %955 = vmatprep.subr.bf16.mxu0 %v1017_v1 }
  0x44   : > { %956 = vmatpush3.bf16.msra.mxu0 %v1008_v45 }
  0x47   : > { %958 = vmatmul.mubr.bf16.vlgmr.msra.gmra.mrb[0].mxu0 %v600_v48 }
 0x109   : > { %v480_v49 = vpop.f32.mrb[0].mxu1 }
 0x10a   : > { %v919_v50 = vpop.f32.mrb[1].mxu1 }
 0x10b   : > { %v483_v51 = vpop.f32.mrb[2].mxu1 }
 0x10c   : > { %v920_v52 = vpop.f32.mrb[3].mxu1 }
 0x11a   : > { %v700_v53 = vpop.f32.mrb[0].mxu0 }
 0x11b   : > { %v961_v54 = vadd.f32 %v700_v53, %v480_v49  ;;  %v959_v55 = vpop.f32.mrb[1].mxu0 }
 0x11c   : > { %v703_v56 = vpop.f32.mrb[2].mxu0 }
 0x11d   : > { %709 = vst [vmem:[%s271_s25] sm:$0xff] %v961_v54  ;;  %v962_v57 = vadd.f32 %v703_v56, %v483_v51  ;;  %v960_v58 = vpop.f32.mrb[3].mxu0 }
 0x11f   : > { %710 = vst [vmem:[%s271_s25 + $0x8] sm:$0xff] %v962_v57 }
 0x120 PF: > { %s16_s21 = sadd.s32 1, %s1015_s21  }
 0x121   : > { %p13_p4 = scmp.ge.s32.totalorder %s16_s21, 4  }
 0x123   :  { %15 = sbr.rel (!%p13_p4) target bundleno = 1 (0x1), region = 79 }

</bundles_post_ra>
